<compile_context>
chip_gen: v7x
topology: tpu7x:2x2x1
jax: 0.10.0
libtpu: 0.0.40
codegen_flags: <defaults>
</compile_context>

<pallas_src>
import functools

import jax
import jax.numpy as jnp
import numpy as np
from jax.experimental import pallas as pl
from jax.experimental.pallas import tpu as pltpu

EPS = 1e-5


# ---------------- fused Pallas kernel ----------------

def fused_block_kernel(pT_ref, wT_ref, gb_ref, out_ref):
    """conv (im2col matmul, transposed/lane-dense) + batch stats + BN + ReLU.

    pT_ref : (K, M)        im2col patches, transposed (K = C*9, M = N*OH*OW)
    wT_ref : (OC, K)       conv weight, flattened (matches pT's K ordering)
    gb_ref : (OC, 2)       column 0 = BN gamma, column 1 = BN beta
    out_ref: (N, OC, OH*OW)
    """
    # Conv as a single MXU matmul: yT[oc, m] with m ordered (n, oh, ow).
    yT = jnp.dot(wT_ref[...], pT_ref[...],
                 preferred_element_type=jnp.float32)            # (OC, M)

    m_total = yT.shape[1]
    inv_m = 1.0 / m_total

    # Per-channel batch statistics: lane-axis reductions (XLU slot).
    # Two-pass (centered) variance for numerical robustness.
    mean = jnp.sum(yT, axis=1, keepdims=True) * inv_m           # (OC, 1)
    centered = yT - mean                                        # (OC, M)
    var = jnp.sum(centered * centered, axis=1, keepdims=True) * inv_m
    inv_std = jax.lax.rsqrt(var + EPS)                          # EUP slot

    gamma = gb_ref[:, 0:1]                                      # (OC, 1)
    beta = gb_ref[:, 1:2]                                       # (OC, 1)
    scale = gamma * inv_std                                     # (OC, 1)

    # BN affine + ReLU, broadcasting (OC,1) along the lane axis.
    outT = jnp.maximum(centered * scale + beta, 0.0)            # (OC, M)

    # Emit (N, OC, OH*OW) directly; column slices are lane-tile aligned
    # (OH*OW is a multiple of 128) so the stores stay unmasked.
    n_batch = out_ref.shape[0]
    ohw = out_ref.shape[2]
    for n in range(n_batch):                                    # static, tiny
        out_ref[n] = outT[:, n * ohw:(n + 1) * ohw]


# ---------------- wrapper ----------------

@functools.partial(jax.jit, static_argnames=("stride", "padding"))
def block_forward(x, w, gamma, beta, *, stride=1, padding=0):
    """x: (N, C, H, W) f32, w: (OC, C, 3, 3) f32, gamma/beta: (OC,) f32."""
    N, C, H, W = x.shape
    OC = w.shape[0]
    OH = (H + 2 * padding - 3) // stride + 1
    OW = (W + 2 * padding - 3) // stride + 1
    OHW = OH * OW
    M = N * OHW
    K = C * 9
    assert OHW % 128 == 0, "OH*OW must be a multiple of 128 for lane-dense stores"

    # ---- glue (fused into one XLA op under jit): transposed im2col ----
    # Transpose only x itself (tiny), then stack taps directly in
    # (c, kh, kw, n, oh, ow) order so the reshape to (K, M) is contiguous
    # and the weight needs no transpose at all.
    xt = jnp.transpose(x, (1, 0, 2, 3))                        # (C, N, H, W)
    xtp = jnp.pad(xt, ((0, 0), (0, 0),
                       (padding, padding), (padding, padding)))
    taps = []
    for dh in range(3):
        for dw in range(3):
            taps.append(xtp[:, :, dh:dh + stride * OH:stride,
                                  dw:dw + stride * OW:stride])  # (C, N, OH, OW)
    pT = jnp.stack(taps, axis=1).reshape(K, M)                 # (C*9, N*OH*OW)
    wT = w.reshape(OC, K)                                      # same (c,kh,kw) order
    gb = jnp.stack([gamma, beta], axis=1)                      # (OC, 2)

    out = pl.pallas_call(
        fused_block_kernel,
        out_shape=jax.ShapeDtypeStruct((N, OC, OHW), jnp.float32),
        in_specs=[
            pl.BlockSpec(memory_space=pltpu.MemorySpace.VMEM),
            pl.BlockSpec(memory_space=pltpu.MemorySpace.VMEM),
            pl.BlockSpec(memory_space=pltpu.MemorySpace.VMEM),
        ],
        out_specs=pl.BlockSpec(memory_space=pltpu.MemorySpace.VMEM),
    )(pT, wT, gb)

    # Only a reshape (no transpose) to reach NCHW.
    return out.reshape(N, OC, OH, OW)


# ---------------- pure-JAX reference (for verification) ----------------

def reference(x, w, gamma, beta, *, stride=1, padding=0):
    y = jax.lax.conv_general_dilated(
        x, w, (stride, stride), [(padding, padding), (padding, padding)],
        dimension_numbers=("NCHW", "OIHW", "NCHW"))
    mean = y.mean(axis=(0, 2, 3), keepdims=True)
    var = y.var(axis=(0, 2, 3), keepdims=True)
    yn = (y - mean) / jnp.sqrt(var + EPS)
    yn = yn * gamma[None, :, None, None] + beta[None, :, None, None]
    return jnp.maximum(yn, 0.0)


if __name__ == "__main__":
    # Block(in_planes=4, out_planes=8, stride=1, padding=1), input (2, 4, 16, 16)
    N, C, OC, H, W = 2, 4, 8, 16, 16
    stride, padding = 1, 1

    key = jax.random.PRNGKey(0)
    kx, kw = jax.random.split(key)
    x = jax.random.normal(kx, (N, C, H, W), dtype=jnp.float32)

    # xavier_uniform_ for conv weight (OC, C, 3, 3): bound = sqrt(6/(fan_in+fan_out))
    fan_in, fan_out = C * 9, OC * 9
    bound = float(np.sqrt(6.0 / (fan_in + fan_out)))
    w = jax.random.uniform(kw, (OC, C, 3, 3), dtype=jnp.float32,
                           minval=-bound, maxval=bound)
    # BatchNorm2d default init: gamma = 1, beta = 0
    gamma = jnp.ones((OC,), dtype=jnp.float32)
    beta = jnp.zeros((OC,), dtype=jnp.float32)

    out = block_forward(x, w, gamma, beta, stride=stride, padding=padding)
    out = jax.block_until_ready(out)

    ref = jax.block_until_ready(reference(x, w, gamma, beta,
                                          stride=stride, padding=padding))
    assert out.shape == ref.shape == (N, OC, H, W)
    np.testing.assert_allclose(np.asarray(out), np.asarray(ref),
                               rtol=1e-4, atol=1e-4)
    print("KERNEL_OK")
</pallas_src>

<mosaic_0001>
module attributes {stable_mosaic.version = 11 : i64} {
  func.func @fused_block_kernel(%arg0: memref<36x512xf32, #tpu.memory_space<vmem>>, %arg1: memref<8x36xf32, #tpu.memory_space<vmem>>, %arg2: memref<8x2xf32, #tpu.memory_space<vmem>>, %arg3: memref<2x8x256xf32, #tpu.memory_space<vmem>>) attributes {dimension_semantics = [], scalar_prefetch = 0 : i64, scratch_operands = 0 : i64, tpu.core_type = #tpu.core_type<tc>} {
    %c0 = arith.constant 0 : index
    %c0_0 = arith.constant 0 : index
    %0 = vector.load %arg1[%c0, %c0_0] : memref<8x36xf32, #tpu.memory_space<vmem>>, vector<8x36xf32>
    %c0_1 = arith.constant 0 : index
    %c0_2 = arith.constant 0 : index
    %1 = vector.load %arg0[%c0_1, %c0_2] : memref<36x512xf32, #tpu.memory_space<vmem>>, vector<36x512xf32>
    %cst = arith.constant dense<0.000000e+00> : vector<8x512xf32>
    %2 = tpu.matmul %0, %1, %cst {dimension_numbers = #tpu.dot_dimension_numbers<[1], [0], [0], [1], [0, 0, 1, 1], [], []>} : vector<8x36xf32>, vector<36x512xf32>, vector<8x512xf32> -> vector<8x512xf32>
    %cst_3 = arith.constant dense<0.000000e+00> : vector<8xf32>
    %3 = vector.multi_reduction <add>, %2, %cst_3 [1] : vector<8x512xf32> to vector<8xf32>
    %4 = vector.shape_cast %3 : vector<8xf32> to vector<8x1xf32>
    %cst_4 = arith.constant 0.001953125 : f32
    %5 = vector.broadcast %cst_4 : f32 to vector<8x1xf32>
    %6 = arith.mulf %4, %5 : vector<8x1xf32>
    %7 = vector.broadcast %6 : vector<8x1xf32> to vector<8x512xf32>
    %8 = arith.subf %2, %7 : vector<8x512xf32>
    %9 = arith.mulf %8, %8 : vector<8x512xf32>
    %cst_5 = arith.constant dense<0.000000e+00> : vector<8xf32>
    %10 = vector.multi_reduction <add>, %9, %cst_5 [1] : vector<8x512xf32> to vector<8xf32>
    %11 = vector.shape_cast %10 : vector<8xf32> to vector<8x1xf32>
    %cst_6 = arith.constant 0.001953125 : f32
    %12 = vector.broadcast %cst_6 : f32 to vector<8x1xf32>
    %13 = arith.mulf %11, %12 : vector<8x1xf32>
    %cst_7 = arith.constant 9.99999974E-6 : f32
    %14 = vector.broadcast %cst_7 : f32 to vector<8x1xf32>
    %15 = arith.addf %13, %14 : vector<8x1xf32>
    %16 = math.rsqrt %15 : vector<8x1xf32>
    %c0_8 = arith.constant 0 : index
    %c0_9 = arith.constant 0 : index
    %17 = vector.load %arg2[%c0_8, %c0_9] : memref<8x2xf32, #tpu.memory_space<vmem>>, vector<8x1xf32>
    %c0_10 = arith.constant 0 : index
    %c1 = arith.constant 1 : index
    %18 = vector.load %arg2[%c0_10, %c1] : memref<8x2xf32, #tpu.memory_space<vmem>>, vector<8x1xf32>
    %19 = arith.mulf %17, %16 : vector<8x1xf32>
    %20 = vector.broadcast %19 : vector<8x1xf32> to vector<8x512xf32>
    %21 = arith.mulf %8, %20 : vector<8x512xf32>
    %22 = vector.broadcast %18 : vector<8x1xf32> to vector<8x512xf32>
    %23 = arith.addf %21, %22 : vector<8x512xf32>
    %cst_11 = arith.constant 0.000000e+00 : f32
    %24 = vector.broadcast %cst_11 : f32 to vector<8x512xf32>
    %25 = arith.maximumf %23, %24 : vector<8x512xf32>
    %26 = vector.extract_strided_slice %25 {offsets = [0, 0], sizes = [8, 256], strides = [1, 1]} : vector<8x512xf32> to vector<8x256xf32>
    %c0_12 = arith.constant 0 : index
    %c0_13 = arith.constant 0 : index
    %c0_14 = arith.constant 0 : index
    %27 = vector.load %arg3[%c0_12, %c0_13, %c0_14] : memref<2x8x256xf32, #tpu.memory_space<vmem>>, vector<1x8x256xf32>
    %28 = vector.shape_cast %27 : vector<1x8x256xf32> to vector<8x256xf32>
    %29 = vector.shape_cast %26 : vector<8x256xf32> to vector<1x8x256xf32>
    tpu.vector_store %arg3[%c0_12, %c0_13, %c0_14], %29 {strides = array<i32>} : memref<2x8x256xf32, #tpu.memory_space<vmem>>, vector<1x8x256xf32>,
    %30 = vector.extract_strided_slice %25 {offsets = [0, 256], sizes = [8, 256], strides = [1, 1]} : vector<8x512xf32> to vector<8x256xf32>
    %c1_15 = arith.constant 1 : index
    %c0_16 = arith.constant 0 : index
    %c0_17 = arith.constant 0 : index
    %31 = vector.load %arg3[%c1_15, %c0_16, %c0_17] : memref<2x8x256xf32, #tpu.memory_space<vmem>>, vector<1x8x256xf32>
    %32 = vector.shape_cast %31 : vector<1x8x256xf32> to vector<8x256xf32>
    %33 = vector.shape_cast %30 : vector<8x256xf32> to vector<1x8x256xf32>
    tpu.vector_store %arg3[%c1_15, %c0_16, %c0_17], %33 {strides = array<i32>} : memref<2x8x256xf32, #tpu.memory_space<vmem>>, vector<1x8x256xf32>,
    return
  }
}

</mosaic_0001>

<bundles_post_ra>
// kernel: block_forward.1
= control target key start
LH: loop header
LB: loop body
LE: loop exit
PB: predicated region body
PF: predicated region fallthrough
CT: control target
= control target key end

     0   :  { %v281_v3 = vmov 0.0   ;;  %vm39_vm0 = vcmask 1043456   ;;  %vm35_vm1 = vcmask 293888   ;;  %v282_v50 = vmov 0   ;;  %s382_s0 = inlined_call_operand.vmem [shape: f32[36,512], index: 0, kind: input, shape index: {}]   ;;  %s383_s1 = inlined_call_operand.vmem [shape: f32[8,36], index: 1, kind: input, shape index: {}]   ;;  %s384_s2 = inlined_call_operand.vmem [shape: f32[8,2], index: 2, kind: input, shape index: {}]   ;;  %s385_s3 = inlined_call_operand.vmem [shape: f32[2,8,256], index: 3, kind: output, shape index: {}]  }
   0x1   :  { %v16_v0 = vld [vmem:[%s382_s0 + $0x8] sm:$0xff]  ;;  %v15_v2 = vld [vmem:[%s382_s0] sm:$0xff]  ;;  %116 = vmatprep.mubr.f32.mxu0 %v281_v3  ;;  %187 = vmatprep.mubr.f32.mxu1 %v281_v3  ;;  %v18_v6 = vld [vmem:[%s382_s0 + $0x18] sm:$0xff]  ;;  %v283_v51 = vmov 1  }
   0x2   :  { %v20_v1 = vld [vmem:[%s382_s0 + $0x28] sm:$0xff]  ;;  %v19_v5 = vld [vmem:[%s382_s0 + $0x20] sm:$0xff]  ;;  %v22_v7 = vld [vmem:[%s382_s0 + $0x38] sm:$0xff]  ;;  %276 = vset.pattern.permute.xlu1 %v282_v50  ;;  %278 = vset.pattern.permute.xlu0 %v283_v51 }
   0x3   :  { %v257_v4 = vpack.c.bf16 %v20_v1, %v16_v0  ;;  %v259_v8 = vpack.c.bf16 %v19_v5, %v15_v2  ;;  %v265_v9 = vpack.c.bf16 %v22_v7, %v18_v6  ;;  %v17_v10 = vld [vmem:[%s382_s0 + $0x10] sm:$0xff]  ;;  %v24_v12 = vld [vmem:[%s382_s0 + $0x48] sm:$0xff]  ;;  %v23_v15 = vld [vmem:[%s382_s0 + $0x40] sm:$0xff] }
   0x4   :  { %v21_v11 = vld [vmem:[%s382_s0 + $0x30] sm:$0xff]  ;;  %v28_v14 = vld [vmem:[%s382_s0 + $0x68] sm:$0xff]  ;;  %v27_v16 = vld [vmem:[%s382_s0 + $0x60] sm:$0xff] }
   0x5   :  { %258 = vmatprep.subr.bf16.mxu0 %v257_v4  ;;  %v267_v13 = vpack.c.bf16 %v21_v11, %v17_v10  ;;  %266 = vmatprep.subr.bf16.mxu1 %v265_v9  ;;  %v261_v17 = vpack.c.bf16 %v28_v14, %v24_v12  ;;  %v263_v18 = vpack.c.bf16 %v27_v16, %v23_v15  ;;  %v26_v19 = vld [vmem:[%s382_s0 + $0x58] sm:$0xff]  ;;  %v25_v21 = vld [vmem:[%s382_s0 + $0x50] sm:$0xff]  ;;  %v32_v25 = vld [vmem:[%s382_s0 + $0x88] sm:$0xf] }
   0x6   :  { %260 = vmatpush1.bf16.msra.mxu0 %v259_v8  ;;  %v30_v20 = vld [vmem:[%s382_s0 + $0x78] sm:$0xff]  ;;  %v29_v23 = vld [vmem:[%s382_s0 + $0x70] sm:$0xff]  ;;  %v31_v27 = vld [vmem:[%s382_s0 + $0x80] sm:$0xf] }
   0x7   :  { %268 = vmatpush1.bf16.msra.mxu1 %v267_v13  ;;  %v269_v22 = vpack.c.bf16 %v30_v20, %v26_v19  ;;  %262 = vmatprep.subr.bf16.mxu0 %v261_v17  ;;  %v271_v24 = vpack.c.bf16 %v29_v23, %v25_v21  ;;  %v34_v26 = vld [vmem:[%s382_s0 + $0x98] sm:$0xf]  ;;  %v14_v28 = vld [vmem:[%s383_s1] sm:$0xff]  ;;  %v33_v29 = vld [vmem:[%s382_s0 + $0x90] sm:$0xf] }
   0x8   :  { %v216_v55 = vld [vmem:[%s384_s2] sm:$0xff] }
   0x9   :  { %270 = vmatprep.subr.bf16.mxu1 %v269_v22 }
   0xa   :  { %264 = vmatpush1.bf16.msra.mxu0 %v263_v18 }
   0xb   :  { %272 = vmatpush1.bf16.msra.mxu1 %v271_v24  ;;  %249 = vmatprep.subr.msk.mxu0 %vm39_vm0, %v32_v25 }
   0xc   :  { %252 = vmatprep.subr.msk.mxu1 %vm39_vm0, %v34_v26 }
   0xe   :  { %250 = vmatpush1.msk.msra.mxu0 %vm39_vm0, %v31_v27 }
   0xf   :  { %251 = vmatmul.mubr.msk.f32.vlgmr.msra.gmra.mrb[0].mxu0 %vm35_vm1, %v14_v28  ;;  %253 = vmatpush1.msk.msra.mxu1 %vm39_vm0, %v33_v29 }
  0x10   :  { %254 = vmatmul.mubr.msk.f32.vlgmr.msra.gmra.mrb[0].mxu1 %vm35_vm1, %v14_v28 }
  0xe2   :  { %v118_v30 = vpop.f32.mrb[0].mxu0 }
  0xe3   :  { %v120_v31 = vpop.f32.mrb[1].mxu0  ;;  %v189_v32 = vpop.f32.mrb[0].mxu1 }
  0xe4   :  { %v194_v33 = vadd.f32 %v120_v31, %v118_v30  ;;  %v191_v34 = vpop.f32.mrb[1].mxu1 }
  0xe6   :  { %v195_v35 = vadd.f32 %v194_v33, %v189_v32 }
  0xe8   :  { %v196_v36 = vadd.f32 %v195_v35, %v191_v34 }
  0xea   :  { %197 = vadd.xlane.f32.xlu0 %v196_v36 }
 0x177   :  { %v198_v37 = vpop.xlane.xlu0 %197 }
 0x178   :  { %v199_v38 = vmul.f32 0.001953125, %v198_v37 }
 0x17a   :  { %v200_v39 = vsub.f32 %v118_v30, %v199_v38  ;;  %v201_v40 = vsub.f32 %v120_v31, %v199_v38  ;;  %v202_v41 = vsub.f32 %v189_v32, %v199_v38  ;;  %v203_v42 = vsub.f32 %v191_v34, %v199_v38 }
 0x17c   :  { %v204_v43 = vmul.f32 %v200_v39, %v200_v39  ;;  %v205_v44 = vmul.f32 %v201_v40, %v201_v40  ;;  %v206_v45 = vmul.f32 %v202_v41, %v202_v41  ;;  %v207_v47 = vmul.f32 %v203_v42, %v203_v42 }
 0x17e   :  { %v208_v46 = vadd.f32 %v205_v44, %v204_v43 }
 0x180   :  { %v209_v48 = vadd.f32 %v208_v46, %v206_v45 }
 0x182   :  { %v210_v49 = vadd.f32 %v209_v48, %v207_v47 }
 0x184   :  { %211 = vadd.xlane.f32.xlu0 %v210_v49 }
 0x211   :  { %v212_v52 = vpop.xlane.xlu0 %211 }
 0x212   :  { %v213_v53 = vmul.f32 0.001953125, %v212_v52 }
 0x214   :  { %v214_v54 = vadd.f32 1e-05, %v213_v53 }
 0x216   :  { %279 = vrsqrt.f32 %v214_v54 }
 0x220   :  { %v280_v56 = vpop.eup %279 }
 0x221   :  { %v217_v57 = vmul.f32 %v280_v56, %v216_v55 }
 0x223   :  { %220 = vperm.xlu1 %276, %v217_v57  }
 0x227   :  { %277 = vset.pattern.permute.xlu1 %v283_v51 }
 0x228   :  { %229 = vperm.xlu1 %277, %v216_v55  }
 0x2a2   :  { %v221_v58 = vpop.permute.xlu1 %220 }
 0x2a3   :  { %v223_v59 = vmul.f32 %v221_v58, %v200_v39  ;;  %v224_v60 = vmul.f32 %v221_v58, %v201_v40  ;;  %v225_v61 = vmul.f32 %v221_v58, %v202_v41  ;;  %v226_v62 = vmul.f32 %v221_v58, %v203_v42 }
 0x2a7   :  { %v230_v63 = vpop.permute.xlu1 %229 }
 0x2a8   :  { %v232_v0 = vadd.f32 %v230_v63, %v223_v59  ;;  %v233_v1 = vadd.f32 %v230_v63, %v224_v60  ;;  %v234_v2 = vadd.f32 %v230_v63, %v225_v61  ;;  %v235_v3 = vadd.f32 %v230_v63, %v226_v62 }
 0x2aa   :  { %v236_v4 = vmax.f32 %v232_v0, 0.0  ;;  %v237_v5 = vmax.f32 %v233_v1, 0.0  ;;  %v238_v6 = vmax.f32 %v234_v2, 0.0  ;;  %v239_v7 = vmax.f32 %v235_v3, 0.0 }
 0x2ac   :  { %240 = vst [vmem:[%s385_s3] sm:$0xff] %v236_v4  ;;  %241 = vst [vmem:[%s385_s3 + $0x8] sm:$0xff] %v237_v5 }
 0x2ad   :  { %255 = vst [vmem:[%s385_s3 + $0x10] sm:$0xff] %v238_v6  ;;  %256 = vst [vmem:[%s385_s3 + $0x18] sm:$0xff] %v239_v7 }

</bundles_post_ra>
